<compile_context>
chip_gen: v6e
topology: v6e:2x2x1
jax: 0.10.0
libtpu: 0.0.40
codegen_flags: <defaults>
</compile_context>

<pallas_src>
import functools
import math

import jax
import jax.numpy as jnp
from jax.experimental import pallas as pl
from jax.experimental.pallas import tpu as pltpu


def _round_up(x, m):
    return ((x + m - 1) // m) * m


def policy_net_kernel(x_ref, w1_ref, b1_ref, w2_ref, b2_ref, wh_ref, bh_ref,
                      out_ref, *, action_dim):
    x = x_ref[...]

    # fc1 + tanh
    h1 = jnp.tanh(
        jnp.dot(x, w1_ref[...], preferred_element_type=jnp.float32) + b1_ref[...]
    )

    # fc2 + tanh
    h2 = jnp.tanh(
        jnp.dot(h1, w2_ref[...], preferred_element_type=jnp.float32) + b2_ref[...]
    )

    # Fused mu/std head: one MXU pass over the 128-lane-padded [Wmu | Wstd | 0].
    head = jnp.dot(h2, wh_ref[...], preferred_element_type=jnp.float32) + bh_ref[...]

    # Per-lane epilogue: lanes [0:A) -> (pi/2)*tanh, the rest -> softplus.
    # Both epilogues run on the whole vreg (cheap EUP/VPU work) and a lane
    # select picks the right one, keeping the single store unmasked/lane-dense.
    lane = jax.lax.broadcasted_iota(jnp.int32, head.shape, dimension=1)
    mu_part = (math.pi / 2.0) * jnp.tanh(head)
    std_part = jnp.logaddexp(head, 0.0)  # numerically stable softplus
    out_ref[...] = jnp.where(lane < action_dim, mu_part, std_part)


def policy_net_forward(x, params, *, tile_b=128):
    """Runs the whole MLP as one Pallas program; returns (mu, std)."""
    w1, b1, w2, b2, wmu, bmu, wstd, bstd = params
    batch, state_dim = x.shape
    hidden_dim = w1.shape[1]
    action_dim = wmu.shape[1]

    # Lane-dense fused head weight/bias, zero-padded to a multiple of 128 lanes.
    out_pad = _round_up(max(2 * action_dim, 128), 128)
    wh = jnp.zeros((hidden_dim, out_pad), jnp.float32)
    wh = wh.at[:, :action_dim].set(wmu)
    wh = wh.at[:, action_dim:2 * action_dim].set(wstd)
    bh = jnp.zeros((1, out_pad), jnp.float32)
    bh = bh.at[:, :action_dim].set(bmu)
    bh = bh.at[:, action_dim:2 * action_dim].set(bstd)

    kernel = functools.partial(policy_net_kernel, action_dim=action_dim)

    cost = pl.CostEstimate(
        flops=2 * batch * (state_dim * hidden_dim
                           + hidden_dim * hidden_dim
                           + hidden_dim * out_pad),
        transcendentals=batch * (2 * hidden_dim + 2 * out_pad),
        bytes_accessed=4 * (x.size + w1.size + b1.size + w2.size + b2.size
                            + wh.size + bh.size + batch * out_pad),
    )

    out_shape = jax.ShapeDtypeStruct((batch, out_pad), jnp.float32)

    use_grid = (batch % tile_b == 0) and (batch // tile_b > 1)
    if use_grid:
        # Pipelined batch grid: x/out tiled over batch, weights VMEM-resident
        # via constant index_map; parallel axis -> megacore sharding on v7x.
        out = pl.pallas_call(
            kernel,
            out_shape=out_shape,
            grid=(batch // tile_b,),
            in_specs=[
                pl.BlockSpec((tile_b, state_dim), lambda i: (i, 0)),
                pl.BlockSpec((state_dim, hidden_dim), lambda i: (0, 0)),
                pl.BlockSpec((1, hidden_dim), lambda i: (0, 0)),
                pl.BlockSpec((hidden_dim, hidden_dim), lambda i: (0, 0)),
                pl.BlockSpec((1, hidden_dim), lambda i: (0, 0)),
                pl.BlockSpec((hidden_dim, out_pad), lambda i: (0, 0)),
                pl.BlockSpec((1, out_pad), lambda i: (0, 0)),
            ],
            out_specs=pl.BlockSpec((tile_b, out_pad), lambda i: (i, 0)),
            compiler_params=pltpu.CompilerParams(
                dimension_semantics=("parallel",)),
            cost_estimate=cost,
        )(x, w1, b1, w2, b2, wh, bh)
    else:
        # Tiny batch: single block, everything resident in VMEM, no grid.
        vmem_spec = pl.BlockSpec(memory_space=pltpu.VMEM)
        out = pl.pallas_call(
            kernel,
            out_shape=out_shape,
            in_specs=[vmem_spec] * 7,
            out_specs=vmem_spec,
            cost_estimate=cost,
        )(x, w1, b1, w2, b2, wh, bh)

    mu = out[:, :action_dim]
    std = out[:, action_dim:2 * action_dim]
    return mu, std


def init_params(key, state_dim, hidden_dim, action_dim):
    """Deterministic PyTorch-Linear-style (uniform +/- 1/sqrt(fan_in)) init."""
    def linear(key, fan_in, fan_out):
        kw, kb = jax.random.split(key)
        bound = 1.0 / math.sqrt(fan_in)
        w = jax.random.uniform(kw, (fan_in, fan_out), jnp.float32, -bound, bound)
        b = jax.random.uniform(kb, (1, fan_out), jnp.float32, -bound, bound)
        return w, b

    k1, k2, k3, k4 = jax.random.split(key, 4)
    w1, b1 = linear(k1, state_dim, hidden_dim)
    w2, b2 = linear(k2, hidden_dim, hidden_dim)
    wmu, bmu = linear(k3, hidden_dim, action_dim)
    wstd, bstd = linear(k4, hidden_dim, action_dim)
    return (w1, b1, w2, b2, wmu, bmu, wstd, bstd)


def reference_forward(x, params):
    """Pure-JAX reference for correctness check."""
    w1, b1, w2, b2, wmu, bmu, wstd, bstd = params
    h1 = jnp.tanh(x @ w1 + b1)
    h2 = jnp.tanh(h1 @ w2 + b2)
    mu = (math.pi / 2.0) * jnp.tanh(h2 @ wmu + bmu)
    std = jax.nn.softplus(h2 @ wstd + bstd)
    return mu, std


if __name__ == "__main__":
    # Small shapes consistent with the module: obs vector -> hidden -> action.
    batch = 2
    state_dim = 8
    hidden_dim = 32
    action_dim = 2

    key = jax.random.PRNGKey(0)
    key_x, key_xb, key_p = jax.random.split(key, 3)

    params = init_params(key_p, state_dim, hidden_dim, action_dim)

    # 1) Tiny batch -> single-block (no grid) path.
    x_small = jax.random.normal(key_x, (batch, state_dim), dtype=jnp.float32)
    mu, std = policy_net_forward(x_small, params)
    mu, std = jax.block_until_ready((mu, std))
    mu_ref, std_ref = reference_forward(x_small, params)
    assert mu.shape == (batch, action_dim) and std.shape == (batch, action_dim)
    assert jnp.allclose(mu, mu_ref, atol=1e-5, rtol=1e-5)
    assert jnp.allclose(std, std_ref, atol=1e-5, rtol=1e-5)

    # 2) Larger batch -> pipelined, core-parallel batch-grid path.
    big_batch = 256
    x_big = jax.random.normal(key_xb, (big_batch, state_dim), dtype=jnp.float32)
    mu_b, std_b = policy_net_forward(x_big, params, tile_b=128)
    mu_b, std_b = jax.block_until_ready((mu_b, std_b))
    mu_br, std_br = reference_forward(x_big, params)
    assert jnp.allclose(mu_b, mu_br, atol=1e-5, rtol=1e-5)
    assert jnp.allclose(std_b, std_br, atol=1e-5, rtol=1e-5)

    print("KERNEL_OK")
</pallas_src>

<mosaic_0001>
module attributes {stable_mosaic.version = 11 : i64} {
  func.func @policy_net_kernel(%arg0: memref<2x8xf32, #tpu.memory_space<vmem>>, %arg1: memref<8x32xf32, #tpu.memory_space<vmem>>, %arg2: memref<1x32xf32, #tpu.memory_space<vmem>>, %arg3: memref<32x32xf32, #tpu.memory_space<vmem>>, %arg4: memref<1x32xf32, #tpu.memory_space<vmem>>, %arg5: memref<32x128xf32, #tpu.memory_space<vmem>>, %arg6: memref<1x128xf32, #tpu.memory_space<vmem>>, %arg7: memref<2x128xf32, #tpu.memory_space<vmem>>) attributes {dimension_semantics = [], scalar_prefetch = 0 : i64, scratch_operands = 0 : i64, tpu.core_type = #tpu.core_type<tc>} {
    %c0 = arith.constant 0 : index
    %c0_0 = arith.constant 0 : index
    %0 = vector.load %arg0[%c0, %c0_0] : memref<2x8xf32, #tpu.memory_space<vmem>>, vector<2x8xf32>
    %c0_1 = arith.constant 0 : index
    %c0_2 = arith.constant 0 : index
    %1 = vector.load %arg1[%c0_1, %c0_2] : memref<8x32xf32, #tpu.memory_space<vmem>>, vector<8x32xf32>
    %cst = arith.constant dense<0.000000e+00> : vector<2x32xf32>
    %2 = tpu.matmul %0, %1, %cst {dimension_numbers = #tpu.dot_dimension_numbers<[1], [0], [0], [1], [0, 0, 1, 1], [], []>} : vector<2x8xf32>, vector<8x32xf32>, vector<2x32xf32> -> vector<2x32xf32>
    %c0_3 = arith.constant 0 : index
    %c0_4 = arith.constant 0 : index
    %3 = vector.load %arg2[%c0_3, %c0_4] : memref<1x32xf32, #tpu.memory_space<vmem>>, vector<1x32xf32>
    %4 = vector.broadcast %3 : vector<1x32xf32> to vector<2x32xf32>
    %5 = arith.addf %2, %4 : vector<2x32xf32>
    %6 = math.tanh %5 : vector<2x32xf32>
    %c0_5 = arith.constant 0 : index
    %c0_6 = arith.constant 0 : index
    %7 = vector.load %arg3[%c0_5, %c0_6] : memref<32x32xf32, #tpu.memory_space<vmem>>, vector<32x32xf32>
    %cst_7 = arith.constant dense<0.000000e+00> : vector<2x32xf32>
    %8 = tpu.matmul %6, %7, %cst_7 {dimension_numbers = #tpu.dot_dimension_numbers<[1], [0], [0], [1], [0, 0, 1, 1], [], []>} : vector<2x32xf32>, vector<32x32xf32>, vector<2x32xf32> -> vector<2x32xf32>
    %c0_8 = arith.constant 0 : index
    %c0_9 = arith.constant 0 : index
    %9 = vector.load %arg4[%c0_8, %c0_9] : memref<1x32xf32, #tpu.memory_space<vmem>>, vector<1x32xf32>
    %10 = vector.broadcast %9 : vector<1x32xf32> to vector<2x32xf32>
    %11 = arith.addf %8, %10 : vector<2x32xf32>
    %12 = math.tanh %11 : vector<2x32xf32>
    %c0_10 = arith.constant 0 : index
    %c0_11 = arith.constant 0 : index
    %13 = vector.load %arg5[%c0_10, %c0_11] : memref<32x128xf32, #tpu.memory_space<vmem>>, vector<32x128xf32>
    %cst_12 = arith.constant dense<0.000000e+00> : vector<2x128xf32>
    %14 = tpu.matmul %12, %13, %cst_12 {dimension_numbers = #tpu.dot_dimension_numbers<[1], [0], [0], [1], [0, 0, 1, 1], [], []>} : vector<2x32xf32>, vector<32x128xf32>, vector<2x128xf32> -> vector<2x128xf32>
    %c0_13 = arith.constant 0 : index
    %c0_14 = arith.constant 0 : index
    %15 = vector.load %arg6[%c0_13, %c0_14] : memref<1x128xf32, #tpu.memory_space<vmem>>, vector<1x128xf32>
    %16 = vector.broadcast %15 : vector<1x128xf32> to vector<2x128xf32>
    %17 = arith.addf %14, %16 : vector<2x128xf32>
    %18 = tpu.iota {dimensions = array<i32: 1>} : vector<2x128xi32>
    %19 = math.tanh %17 : vector<2x128xf32>
    %cst_15 = arith.constant 1.57079637 : f32
    %20 = vector.broadcast %cst_15 : f32 to vector<2x128xf32>
    %21 = arith.mulf %20, %19 : vector<2x128xf32>
    %cst_16 = arith.constant 0.000000e+00 : f32
    %22 = vector.broadcast %cst_16 : f32 to vector<2x128xf32>
    %23 = arith.maximumf %17, %22 : vector<2x128xf32>
    %24 = vector.broadcast %cst_16 : f32 to vector<2x128xf32>
    %25 = arith.subf %17, %24 : vector<2x128xf32>
    %26 = arith.cmpf one, %25, %25 : vector<2x128xf32>
    %27 = vector.broadcast %cst_16 : f32 to vector<2x128xf32>
    %28 = arith.addf %17, %27 : vector<2x128xf32>
    %29 = math.absf %25 : vector<2x128xf32>
    %cst_17 = arith.constant 0.000000e+00 : f32
    %30 = vector.broadcast %cst_17 : f32 to vector<2x128xf32>
    %31 = arith.subf %30, %29 : vector<2x128xf32>
    %32 = math.exp %31 : vector<2x128xf32>
    %33 = math.log1p %32 : vector<2x128xf32>
    %34 = arith.addf %23, %33 : vector<2x128xf32>
    %35 = arith.select %26, %28, %34 : vector<2x128xi1>, vector<2x128xf32>
    %c2_i32 = arith.constant 2 : i32
    %36 = vector.broadcast %c2_i32 : i32 to vector<2x128xi32>
    %37 = arith.cmpi slt, %18, %36 : vector<2x128xi32>
    %38 = arith.select %37, %21, %35 : vector<2x128xi1>, vector<2x128xf32>
    %c0_18 = arith.constant 0 : index
    %c0_19 = arith.constant 0 : index
    %39 = vector.load %arg7[%c0_18, %c0_19] : memref<2x128xf32, #tpu.memory_space<vmem>>, vector<2x128xf32>
    tpu.vector_store %arg7[%c0_18, %c0_19], %38 {strides = array<i32>} : memref<2x128xf32, #tpu.memory_space<vmem>>, vector<2x128xf32>,
    return
  }
}

</mosaic_0001>

<bundles_post_ra>
// kernel: tpu_custom_call.1
= control target key start
LH: loop header
LB: loop body
LE: loop exit
PB: predicated region body
PF: predicated region fallthrough
CT: control target
= control target key end

     0   :  { %12 = vsyncpa [#allocation3], 0  ;;  %s621_s0 = inlined_call_operand.hbm [shape: f32[2,8], index: 0, kind: input, shape index: {}]   ;;  %s622_s1 = inlined_call_operand.hbm [shape: f32[8,32], index: 1, kind: input, shape index: {}]   ;;  %s623_s2 = inlined_call_operand.vmem [shape: f32[1,32], index: 2, kind: input, shape index: {}]   ;;  %s624_s3 = inlined_call_operand.hbm [shape: f32[32,32], index: 3, kind: input, shape index: {}]   ;;  %s625_s4 = inlined_call_operand.vmem [shape: f32[1,32], index: 4, kind: input, shape index: {}]   ;;  %s626_s5 = inlined_call_operand.hbm [shape: f32[32,128], index: 5, kind: input, shape index: {}]   ;;  %s627_s6 = inlined_call_operand.vmem [shape: f32[1,128], index: 6, kind: input, shape index: {}]   ;;  %s628_s7 = inlined_call_operand.hbm [shape: f32[2,128], index: 7, kind: output, shape index: {}]  }
   0x1   :  { %13 = vsyncpa [#allocation6], 0 }
   0x2   :  { %14 = vsyncpa [#allocation9], 0 }
   0x3   :  { %15 = vsyncpa [#allocation4], 0  ;;  %s546_s24 = smov [#allocation5]   ;;  %s547_s26 = smov [#allocation2]  }
   0x4   :  { %s32_s25 = sshll.u32 %s546_s24, 4  ;;  %s22_s27 = sshll.u32 %s547_s26, 4  ;;  %s33_s25 = int_to_ptr.vmem [resolvable:$true] %s32_s25  ;;  %s23_s27 = int_to_ptr.vmem [resolvable:$true] %s22_s27 }
   0x5   :  { %s446_s28 = scalar_lea.vmem %s33_s25, 128  ;;  %p451_p1 = scmp.lt.s32.totalorder %s33_s25, %s33_s25 }
   0x6   :  { %p447_p0 = scmp.ne.s32.totalorder %s33_s25, %s446_s28  ;;  %p452_p2 = scmp.lt.s32.totalorder %s446_s28, %s446_s28 }
   0x8   :  { %p453_p3 = por %p452_p2, %p451_p1 }
   0xa   :  { %p454_p4 = pnand %p453_p3, %p447_p0 }
   0xc   :  { %457 = shalt.err (!%p454_p4)
}
   0xd   :  { %35 = dma.hbm_to_vmem [thread:$0]  %s622_s1, 128, %s33_s25, [#allocation6]  }
   0xe   :  { %s466_s8 = scalar_lea.vmem %s23_s27, 32  ;;  %p471_p6 = scmp.lt.s32.totalorder %s23_s27, %s23_s27 }
   0xf   :  { %p467_p5 = scmp.ne.s32.totalorder %s23_s27, %s466_s8  ;;  %p472_p7 = scmp.lt.s32.totalorder %s466_s8, %s466_s8 }
  0x11   :  { %p473_p8 = por %p472_p7, %p471_p6 }
  0x13   :  { %p474_p9 = pnand %p473_p8, %p467_p5 }
  0x15   :  { %477 = shalt.err (!%p474_p9)
}
  0x16   :  { %25 = dma.hbm_to_vmem [thread:$0]  %s621_s0, 32, %s23_s27, [#allocation3]  }
  0x17   :  { %s548_s11 = smov [#allocation7]  }
  0x18   :  { %s43_s12 = sshll.u32 %s548_s11, 4  ;;  %s44_s12 = int_to_ptr.vmem [resolvable:$true] %s43_s12 }
  0x19   :  { %s486_s13 = scalar_lea.vmem %s44_s12, 512  ;;  %p491_p11 = scmp.lt.s32.totalorder %s44_s12, %s44_s12 }
  0x1a   :  { %p487_p10 = scmp.ne.s32.totalorder %s44_s12, %s486_s13  ;;  %p492_p12 = scmp.lt.s32.totalorder %s486_s13, %s486_s13 }
  0x1c   :  { %p493_p13 = por %p492_p12, %p491_p11 }
  0x1e   :  { %p494_p0 = pnand %p493_p13, %p487_p10 }
  0x20   :  { %497 = shalt.err (!%p494_p0)
}
  0x21   :  { %s549_s1 = smov 128   ;;  %s550_s14 = smov 8  }
  0x22   :  { %49 = dma.hbm_to_vmem [thread:$0]  %s624_s3, 512, %s44_s12, [#allocation6], %s549_s1, %s549_s1, %s550_s14  }
  0x23   :  { %s551_s17 = smov [#allocation8]  }
  0x24   :  { %s57_s18 = sshll.u32 %s551_s17, 4  ;;  %s58_s18 = int_to_ptr.vmem [resolvable:$true] %s57_s18 }
  0x25   :  { %s506_s0 = scalar_lea.vmem %s58_s18, 512  ;;  %p511_p2 = scmp.lt.s32.totalorder %s58_s18, %s58_s18 }
  0x26   :  { %p507_p1 = scmp.ne.s32.totalorder %s58_s18, %s506_s0  ;;  %p512_p3 = scmp.lt.s32.totalorder %s506_s0, %s506_s0 }
  0x28   :  { %p513_p4 = por %p512_p3, %p511_p2 }
  0x2a   :  { %p514_p5 = pnand %p513_p4, %p507_p1 }
  0x2c   :  { %517 = shalt.err (!%p514_p5)
}
  0x2d   :  { %63 = dma.hbm_to_vmem [thread:$0]  %s626_s5, 512, %s58_s18, [#allocation9], %s549_s1, %s549_s1, %s550_s14  }
  0x2e   :  { %538 = dma.done.wait [#allocation3], 32  }
  0x2f   :  { %539 = vsyncadd [#allocation3], 4294967264 }
  0x30   :  { %540 = dma.done.wait [#allocation6], 640  }
  0x31   :  { %541 = vsyncadd [#allocation6], 4294966656 }
  0x32   :  { %542 = dma.done.wait [#allocation9], 512  }
  0x33   :  { %543 = vsyncadd [#allocation9], 4294966784  ;;  %v552_v0 = vmov 0.0   ;;  %vm553_vm0 = vmmov 0   ;;  %vm87_vm1 = vcmask 64512   ;;  %v79_v1 = vld [vmem:[#allocation5] sm:$0xff]  ;;  %v332_v31 = vlaneseq }
  0x34   :  { %392 = vmatprep.subr.mxu0 %v552_v0  ;;  %394 = vmatprep.mubr.msk.f32.mxu0 %vm553_vm0, %v552_v0  ;;  %v78_v2 = vld [vmem:[#allocation2] sm:$0x3]  ;;  %v165_v3 = vld [vmem:[#allocation7 + $0x18] sm:$0xff]  ;;  %v163_v5 = vld [vmem:[#allocation7 + $0x8] sm:$0xff]  ;;  %vm173_vm2 = vcmask 261120  }
  0x35   :  { %397 = vmatprep.subr.mxu1 %v552_v0  ;;  %405 = vmatprep.mubr.msk.f32.mxu1 %vm553_vm0, %v552_v0  ;;  %v164_v4 = vld [vmem:[#allocation7 + $0x10] sm:$0xff]  ;;  %v162_v6 = vld [vmem:[#allocation7] sm:$0xff]  ;;  %v251_v12 = vld [vmem:[#allocation8 + $0x18] sm:$0xff]  ;;  %v333_v35 = vand.u32 127, %v332_v31 }
  0x36   :  { %393 = vmatpush3.msra.mxu0 %v79_v1  ;;  %398 = vmatpush3.msra.mxu1 %v165_v3  ;;  %v374_v7 = vld [vmem:[%s623_s2] ss:$0 sm:$0xff]  ;;  %v249_v14 = vld [vmem:[#allocation8 + $0x8] sm:$0xff]  ;;  %v248_v15 = vld [vmem:[#allocation8] sm:$0xff] }
  0x37   :  { %395 = vmatmul.mubr.msk.f32.vlgmr.msra.gmra.mxu0 %vm87_vm1, %v78_v2  ;;  %408 = vmatprep.subr.mxu0 %v552_v0  ;;  %v250_v13 = vld [vmem:[#allocation8 + $0x10] sm:$0xff]  ;;  %vm354_vm4 = vcmp.lt.s32.totalorder %v333_v35, 2 }
  0x38   :  { %416 = vmatprep.mubr.msk.f32.mxu0 %vm553_vm0, %v552_v0  ;;  %399 = vmatprep.subr.mxu1 %v552_v0  ;;  %v376_v16 = vld [vmem:[%s625_s4] ss:$0 sm:$0xff]  ;;  %s554_s4 = smov [#allocation10]  }
  0x39   :  { %400 = vmatpush3.msra.mxu1 %v164_v4  ;;  %409 = vmatpush3.msra.mxu0 %v251_v12  ;;  %v378_v21 = vld [vmem:[%s627_s6] ss:$0 sm:$0xff]  ;;  %s363_s6 = sshll.u32 %s554_s4, 4  ;;  %s364_s6 = int_to_ptr.vmem [resolvable:$true] %s363_s6 }
  0x3a   :  { %401 = vmatprep.subr.mxu1 %v552_v0  ;;  %410 = vmatprep.subr.mxu0 %v552_v0  ;;  %s518_s24 = scalar_lea.vmem %s364_s6, 32  ;;  %p523_p7 = scmp.lt.s32.totalorder %s364_s6, %s364_s6 }
  0x3b   :  { %402 = vmatpush3.msra.mxu1 %v163_v5  ;;  %411 = vmatpush3.msra.mxu0 %v250_v13  ;;  %p519_p6 = scmp.ne.s32.totalorder %s364_s6, %s518_s24  ;;  %p524_p8 = scmp.lt.s32.totalorder %s518_s24, %s518_s24 }
  0x3c   :  { %403 = vmatprep.subr.mxu1 %v552_v0  ;;  %412 = vmatprep.subr.mxu0 %v552_v0 }
  0x3d   :  { %404 = vmatpush3.msra.mxu1 %v162_v6  ;;  %413 = vmatpush3.msra.mxu0 %v249_v14  ;;  %p525_p9 = por %p524_p8, %p523_p7 }
  0x3e   :  { %414 = vmatprep.subr.mxu0 %v552_v0 }
  0x3f   :  { %415 = vmatpush3.msra.mxu0 %v248_v15  ;;  %p526_p10 = pnand %p525_p9, %p519_p6 }
  0xf7   :  { %v157_v8 = vpop.f32.mrf.mxu0 }
  0xf8   :  { %v158_v9 = vadd.f32 %v374_v7, %v157_v8 }
  0xf9   :  { %v396_v10 = vpop.f32.mrf.mxu0 }
  0xfa   :  { %428 = vtanh.f32 %v158_v9 }
 0x107   :  { %v429_v11 = vpop.eup %428 }
 0x108   :  { %406 = vmatmul.mubr.msk.f32.vlgmr.msra.gmra.mxu1 %vm173_vm2, %v429_v11 }
 0x1c8   :  { %v243_v17 = vpop.f32.mrf.mxu1 }
 0x1c9   :  { %v244_v18 = vadd.f32 %v376_v16, %v243_v17 }
 0x1ca   :  { %v407_v19 = vpop.f32.mrf.mxu1 }
 0x1cb   :  { %430 = vtanh.f32 %v244_v18 }
 0x1d8   :  { %v431_v20 = vpop.eup %430 }
 0x1d9   :  { %417 = vmatmul.mubr.msk.f32.vlgmr.msra.gmra.mxu0 %vm173_vm2, %v431_v20 }
 0x299   :  { %v328_v22 = vpop.f32.mrf.mxu0 }
 0x29a   :  { %v329_v23 = vadd.f32 %v378_v21, %v328_v22 }
 0x29b   :  { %v418_v24 = vpop.f32.mrf.mxu0 }
 0x29c   :  { %v339_v25 = vand.u32 2147483647, %v329_v23  ;;  %v336_v39 = vmax.f32 %v329_v23, 0.0  ;;  %vm337_vm5 = vcmp.ne.f32.partialorder %v329_v23, %v329_v23 }
 0x29e   :  { %v340_v26 = vsub.f32 0.0, %v339_v25 }
 0x2a0   :  { %v341_v27 = vmul.f32 1.442695, %v340_v26 }
 0x2a2   :  { %432 = vpow2.f32 %v341_v27 }
 0x2af   :  { %v433_v28 = vpop.eup %432 }
 0x2b0   :  { %v343_v29 = vadd.f32 1.0, %v433_v28  ;;  %v346_v30 = vmul.f32 -0.5, %v433_v28  ;;  %v349_v33 = vand.u32 2147483647, %v433_v28 }
 0x2b2   :  { %434 = vlog2.f32 %v343_v29  ;;  %v347_v32 = vadd.f32 1.0, %v346_v30  ;;  %vm350_vm3 = vcmp.lt.f32.partialorder %v349_v33, 0.0004427343 }
 0x2b3   :  { %436 = vtanh.f32 %v329_v23 }
 0x2b4   :  { %v348_v37 = vmul.f32 %v433_v28, %v347_v32 }
 0x2bf   :  { %v435_v34 = vpop.eup %434 }
 0x2c0   :  { %v345_v36 = vmul.f32 0.6931472, %v435_v34  ;;  %v437_v38 = vpop.eup %436 }
 0x2c1   :  { %v335_v42 = vmul.f32 1.5707964, %v437_v38 }
 0x2c2   :  { %v351_v40 = vsel %vm350_vm3, %v348_v37, %v345_v36 }
 0x2c3   :  { %v352_v41 = vadd.f32 %v351_v40, %v336_v39 }
 0x2c5   :  { %v353_v43 = vsel %vm337_vm5, %v329_v23, %v352_v41 }
 0x2c6   :  { %v355_v44 = vsel %vm354_vm4, %v335_v42, %v353_v43 }
 0x2c7   :  { %356 = vst [vmem:[#allocation10] sm:$0x3] %v355_v44 }
 0x2c8   :  { %529 = shalt.err (!%p526_p10)
}
 0x2c9   :  { %366 = dma.vmem_to_hbm [thread:$0]  %s364_s6, 32, %s628_s7, [#allocation4]  }
 0x2ca   :  { %544 = dma.done.wait [#allocation4], 32  }
 0x2cb   :  { %545 = vsyncadd [#allocation4], 4294967264 }
 0x2cc   :  { %370 = vsyncpa [#allocation3], 1 }
 0x2cd   :  { %371 = vsyncpa [#allocation6], 1 }
 0x2ce   :  { %372 = vsyncpa [#allocation9], 1 }
 0x2cf   :  { %373 = vsyncpa [#allocation4], 1 }

</bundles_post_ra>
